<compile_context>
chip_gen: v7x
topology: tpu7x:2x2x1
jax: 0.10.0
libtpu: 0.0.40
codegen_flags: <defaults>
</compile_context>

<pallas_src>
import jax
import jax.numpy as jnp
import numpy as np
from jax.experimental import pallas as pl
from jax.experimental.pallas import tpu as pltpu

NUM_HEADS = 12
HEAD_DIM = 64
HIDDEN = NUM_HEADS * HEAD_DIM  # 768


def _copy_kernel(x_ref, o_ref):
    # Lane-dense pass-through of a (1, tS, 768) block.  This is where real
    # fused compute would go; the head-split reshape is free in the wrapper.
    o_ref[...] = x_ref[...]


def _pick_seq_tile(s: int, dbytes: int) -> int:
    """Pick a seq tile that is sublane-aligned for the dtype, keeps blocks
    <= ~3 MiB (safe for v7x's 32 MiB scoped VMEM with double buffering), and
    yields >= 2 grid steps whenever S permits (pipelining + v7x megacore)."""
    align = {4: 8, 2: 16, 1: 32}.get(dbytes, 32)
    # Cap rows so one block stays <= ~3 MiB.
    max_rows = max(align, ((3 << 20) // (HIDDEN * dbytes)) // align * align)
    if s <= align:
        # Tiny input: one full block (full-extent dims need no (8,128) padding).
        return s
    # Largest aligned divisor of s that still leaves >= 2 grid steps.
    best = None
    t = align
    limit = min(max_rows, s // 2)
    while t <= limit:
        if s % t == 0:
            best = t
        t += align
    if best is not None:
        return best
    # No aligned divisor: fixed aligned tile; pl.cdiv + Pallas edge masking
    # handle the ragged last block.
    return min(max_rows, max(align, (s // 2) // align * align))


def view_as_heads(x217, x229):
    """Equivalent of M.forward(x229, x217).

    x229: python tuple (1, S) of concrete ints
    x217: jnp array of shape (1, S, 768)
    returns: jnp array of shape (1, S, 12, 64)
    """
    x230 = tuple(x229) + (NUM_HEADS, HEAD_DIM)  # operator.add on tuples
    b, s, h = x217.shape
    assert (b, s) == tuple(x229) and h == HIDDEN and b == 1

    dbytes = jnp.dtype(x217.dtype).itemsize
    ts = _pick_seq_tile(s, dbytes)
    grid = (pl.cdiv(s, ts),)

    out_flat = pl.pallas_call(
        _copy_kernel,
        out_shape=jax.ShapeDtypeStruct((b, s, HIDDEN), x217.dtype),
        grid_spec=pltpu.PrefetchScalarGridSpec(
            num_scalar_prefetch=0,
            grid=grid,
            in_specs=[pl.BlockSpec((1, ts, HIDDEN), lambda i: (0, i, 0))],
            out_specs=pl.BlockSpec((1, ts, HIDDEN), lambda i: (0, i, 0)),
        ),
        # Alias the input buffer to the output: no extra HBM allocation, the
        # scaffold writes back over the same pages it read.
        input_output_aliases={0: 0},
        compiler_params=pltpu.CompilerParams(
            dimension_semantics=("parallel",),
        ),
        cost_estimate=pl.CostEstimate(
            flops=0,
            transcendentals=0,
            bytes_accessed=2 * b * s * HIDDEN * dbytes,
        ),
    )(x217)

    # The actual `view`: a free metadata-only reshape of the contiguous hidden
    # axis, applied outside the kernel.
    return jnp.reshape(out_flat, x230)


if __name__ == "__main__":
    # Small shape consistent with the module: batch=1, seq=64 (hidden must be
    # 768 = 12*64, fixed by the head split).  seq=64 -> tile 32 -> 2 grid steps.
    key = jax.random.PRNGKey(0)
    S = 64
    x_np = np.asarray(jax.random.normal(key, (1, S, HIDDEN), dtype=jnp.float32))
    x217 = jnp.asarray(x_np)  # keep a host copy since the kernel donates x217
    x229 = (1, S)

    y = view_as_heads(x217, x229)
    y = jax.block_until_ready(y)

    ref = x_np.reshape(1, S, NUM_HEADS, HEAD_DIM)
    assert y.shape == (1, S, NUM_HEADS, HEAD_DIM)
    assert y.dtype == jnp.float32
    assert np.array_equal(np.asarray(y), ref)

    print("KERNEL_OK")
</pallas_src>

<mosaic_0001>
module attributes {stable_mosaic.version = 11 : i64} {
  func.func @_copy_kernel(%arg0: i32, %arg1: memref<1x32x768xf32, #tpu.memory_space<vmem>>, %arg2: memref<1x32x768xf32, #tpu.memory_space<vmem>>) attributes {dimension_semantics = [#tpu.dimension_semantics<parallel>], iteration_bounds = array<i64: 2>, scalar_prefetch = 0 : i64, scratch_operands = 0 : i64, tpu.core_type = #tpu.core_type<tc>, window_params = [{transform_indices = @transform_0, window_bounds = array<i64: 1, 32, 768>}, {transform_indices = @transform_1, window_bounds = array<i64: 1, 32, 768>}]} {
    %c0 = arith.constant 0 : index
    %c0_0 = arith.constant 0 : index
    %c0_1 = arith.constant 0 : index
    %0 = vector.load %arg1[%c0, %c0_0, %c0_1] : memref<1x32x768xf32, #tpu.memory_space<vmem>>, vector<1x32x768xf32>
    %c0_2 = arith.constant 0 : index
    %c0_3 = arith.constant 0 : index
    %c0_4 = arith.constant 0 : index
    %1 = vector.load %arg2[%c0_2, %c0_3, %c0_4] : memref<1x32x768xf32, #tpu.memory_space<vmem>>, vector<1x32x768xf32>
    tpu.vector_store %arg2[%c0_2, %c0_3, %c0_4], %0 {strides = array<i32>} : memref<1x32x768xf32, #tpu.memory_space<vmem>>, vector<1x32x768xf32>,
    return
  }
  func.func @transform_0(%arg0: i32) -> (i32, i32, i32) {
    %c0_i32 = arith.constant 0 : i32
    %c0_i32_0 = arith.constant 0 : i32
    %c0_i32_1 = arith.constant 0 : i32
    return %c0_i32, %arg0, %c0_i32_0 : i32, i32, i32
  }
  func.func @transform_1(%arg0: i32) -> (i32, i32, i32) {
    %c0_i32 = arith.constant 0 : i32
    %c0_i32_0 = arith.constant 0 : i32
    %c0_i32_1 = arith.constant 0 : i32
    return %c0_i32, %arg0, %c0_i32_0 : i32, i32, i32
  }
}

</mosaic_0001>

<bundles_post_ra>
// kernel: tpu_custom_call.1
= control target key start
LH: loop header
LB: loop body
LE: loop exit
PB: predicated region body
PF: predicated region fallthrough
CT: control target
= control target key end

     0   :  { %6 = vsyncpa [#allocation3], 0  ;;  %s663_s0 = inlined_call_operand.hbm [shape: f32[1,64,768], index: 0, kind: input, shape index: {}, may-alias: {0,1}]   ;;  %s664_s1 = inlined_call_operand.hbm [shape: f32[1,64,768], index: 1, kind: output, shape index: {}, may-alias: {0,1}]  }
   0x1   :  { %8 = vsyncpa [#allocation3 + $0x1], 0 }
   0x2   :  { %9 = vsyncpa [#allocation4], 0 }
   0x3   :  { %11 = vsyncpa [#allocation4 + $0x1], 0  ;;  %s454_s6 = smov 0   ;;  %s456_s7 = smov 0  }
   0x4   :  { %s458_s8 = smov 0   ;;  %s460_s9 = smov 0  }
   0x5 LB: > { %s475_s10 = sadd.s32 4294967295, %s436_s9   ;;  %s274_s11 = sadd.s32 4294967294, %s436_s9   ;;  %s436_s9 = sphi %s460_s9, %s676_s9   ;;  %s432_s8 = sphi %s458_s8, %s675_s8   ;;  %s428_s7 = sphi %s456_s7, %s674_s7   ;;  %s424_s6 = sphi %s454_s6, %s673_s6  }
   0x6   : > { %s479_s12 = sadd.s32 1, %s436_s9   ;;  %s24_s13 = sadd.s32 1, %s432_s8 }
   0x7   : > { %s21_s14 = ssub.s32 %s436_s9, %s479_s12  ;;  %p31_p0 = scmp.ne.s32.totalorder %s432_s8, %s428_s7 }
   0x8   : > { %p22_p1 = scmp.eq.s32.totalorder %s21_s14, 0  ;;  %p32_p2 = scmp.eq.s32.totalorder %s436_s9, 0 }
   0x9   : > { %p37_p3 = scmp.ne.s32.totalorder %s428_s7, %s424_s6  ;;  %p38_p4 = scmp.eq.s32.totalorder %s475_s10, 0 }
   0xa   : > { %s491_s15 = scalar_select %p22_p1, %s432_s8, %s24_s13  }
   0xb   : > { %p33_p5 = por %p32_p2, %p31_p0  ;;  %p493_p6 = por %p38_p4, %p37_p3 }
   0xc   : > { %p61_p7 = scmp.eq.s32.totalorder %s475_s10, 1  ;;  %p67_p8 = scmp.eq.s32.totalorder %s274_s11, 1 }
   0xd   : > { %p302_p10 = scmp.lt.s32.totalorder %s436_s9, 2  ;;  %s87_s19 = sand.u32 1, %s432_s8  }
   0xe   : > { %p500_p11 = por %p61_p7, %p31_p0  ;;  %p504_p12 = por %p67_p8, %p37_p3 }
   0xf   : > { %s287_s20 = smul.u32 3072, %s436_s9  ;;  %p515_p13 = pnand %p302_p10, %p33_p5 }
  0x10   : > { %s667_s17 = scalar_select %p500_p11, 1, 0 }
  0x11   : > { %s668_s18 = scalar_select %p504_p12, 1, 0 }
  0x12   : > { %s286_s21 = smul.u32 192, %s87_s19  ;;  %s513_s24 = scalar_lea.hbm %s663_s0, %s287_s20 }
  0x13   : > { %s521_s28 = scalar_lea.sflag [#allocation3], %s87_s19  ;;  %s340_s29 = scalar_lea.hbm %s513_s24, 3072 }
  0x14   : > { %s91_s26 = scalar_lea.vmem [#allocation2], %s286_s21  ;;  %p341_p0 = scmp.ne.s32.totalorder %s513_s24, %s340_s29 }
  0x15   : > { %s99_s27 = sshll.u32 %s91_s26, 4  ;;  %p342_p1 = pneg %p515_p13  ;;  %s519_s27 = int_to_ptr.vmem [resolvable:$true] %s99_s27 }
  0x16   : > { %s345_s3 = scalar_lea.hbm %s663_s0, 6144  ;;  %p346_p4 = scmp.lt.u32.totalorder %s513_s24, %s663_s0 }
  0x17   : > { %p343_p2 = pnand %p342_p1, %p341_p0  ;;  %p347_p5 = scmp.lt.u32.totalorder %s345_s3, %s340_s29 }
  0x18   : > { %p349_p8 = scmp.lt.u32.totalorder %s340_s29, %s513_s24 }
  0x19   : > { %p344_p3 = pneg %p343_p2  ;;  %p348_p7 = por %p347_p5, %p346_p4 }
  0x1b   : > { %p350_p10 = por %p349_p8, %p348_p7 }
  0x1d   : > { %p351_p9 = pnand %p350_p10, %p344_p3 }
  0x1f   : > { %354 = shalt.err (!%p351_p9)
}
  0x20   : > { %s355_s11 = scalar_lea.vmem %s519_s27, 3072  ;;  %s438_s13 = smov [#allocation2]  }
  0x21   : > { %p356_p0 = scmp.ne.s32.totalorder %s519_s27, %s355_s11  ;;  %s360_s14 = sshll.u32 %s438_s13, 4  ;;  %s361_s14 = int_to_ptr.vmem [resolvable:$false] %s360_s14 }
  0x22   : > { %s362_s19 = scalar_lea.vmem %s361_s14, 6144  ;;  %p363_p11 = scmp.lt.s32.totalorder %s519_s27, %s361_s14 }
  0x23   : > { %p358_p2 = pnand %p356_p0, %p342_p1  ;;  %p364_p4 = scmp.lt.s32.totalorder %s362_s19, %s355_s11 }
  0x25   : > { %p359_p12 = pneg %p358_p2  ;;  %p365_p5 = por %p364_p4, %p363_p11 }
  0x27   : > { %p366_p7 = pnand %p365_p5, %p359_p12 }
  0x29   : > { %369 = shalt.err (!%p366_p7)
}
  0x2a   : > { %s439_s20 = smov 768   ;;  %s440_s21 = smov 48  }
  0x2b   : > { %297 = dma.hbm_to_vmem [thread:$0]  (!%p515_p13), %s513_s24, 3072, %s519_s27, %s521_s28, %s439_s20, %s439_s20, %s440_s21  }
  0x2c   : > { %p280_p9 = scmp.ge.s32.totalorder %s436_s9, 1  ;;  %p107_p1 = scmp.lt.s32.totalorder %s436_s9, 3 }
  0x2e   : > { %p108_p3 = pnand %p280_p9, %p107_p1 }
  0x2f   : > { %s552_s22 = sand.u32 (!%p108_p3), 1, %s428_s7  }
  0x30   : > { %111 = sbr.rel (%p108_p3) target bundleno = 83 (0x53), region = 24  ;;  %s114_s26 = scalar_lea.sflag (!%p108_p3), [#allocation3], %s552_s22 }
  0x31   : > { %s288_s23 = smul.u32 (!%p108_p3), 192, %s552_s22 }
  0x33   : > { %s556_s29 = scalar_lea.vmem (!%p108_p3), [#allocation2], %s288_s23 }
  0x37   : > { %415 = dma.done.wait (%p493_p6), %s114_s26, 3072  }
  0x38   : > { %417 = vsyncadd (%p493_p6), %s114_s26, 4294964224  ;;  %v138_v0 = vld [vmem:[%s556_s29] sm:$0xff]  ;;  %v139_v1 = vld [vmem:[%s556_s29 + $0x8] sm:$0xff]  ;;  %s565_s24 = scalar_lea.vmem [#allocation5], %s288_s23  ;;  %s289_s16 = smul.u32 3072, %s475_s10 }
  0x39   : > { %v140_v2 = vld [vmem:[%s556_s29 + $0x10] sm:$0xff]  ;;  %162 = vst [vmem:[%s565_s24] sm:$0xff] %v138_v0  ;;  %163 = vst [vmem:[%s565_s24 + $0x8] sm:$0xff] %v139_v1  ;;  %v141_v3 = vld [vmem:[%s556_s29 + $0x18] sm:$0xff]  ;;  %s201_s25 = sshll.u32 %s565_s24, 4  ;;  %s187_s30 = scalar_lea.sflag [#allocation4], %s552_s22  ;;  %s599_s25 = int_to_ptr.vmem [resolvable:$true] %s201_s25 }
  0x3a   : > { %164 = vst [vmem:[%s565_s24 + $0x10] sm:$0xff] %v140_v2  ;;  %v142_v4 = vld [vmem:[%s556_s29 + $0x20] sm:$0xff]  ;;  %v143_v5 = vld [vmem:[%s556_s29 + $0x28] sm:$0xff]  ;;  %165 = vst [vmem:[%s565_s24 + $0x18] sm:$0xff] %v141_v3  ;;  %s610_s28 = scalar_lea.hbm %s664_s1, %s289_s16  ;;  %s370_s2 = scalar_lea.vmem %s599_s25, 3072 }
  0x3b   : > { %166 = vst [vmem:[%s565_s24 + $0x20] sm:$0xff] %v142_v4  ;;  %167 = vst [vmem:[%s565_s24 + $0x28] sm:$0xff] %v143_v5  ;;  %v144_v6 = vld [vmem:[%s556_s29 + $0x30] sm:$0xff]  ;;  %v145_v7 = vld [vmem:[%s556_s29 + $0x38] sm:$0xff]  ;;  %p371_p6 = scmp.ne.s32.totalorder %s599_s25, %s370_s2  ;;  %p670_p11 = scmp.ne.s32.totalorder %s667_s17, 0 }
  0x3c   : > { %v146_v8 = vld [vmem:[%s556_s29 + $0x40] sm:$0xff]  ;;  %168 = vst [vmem:[%s565_s24 + $0x30] sm:$0xff] %v144_v6  ;;  %169 = vst [vmem:[%s565_s24 + $0x38] sm:$0xff] %v145_v7  ;;  %v147_v9 = vld [vmem:[%s556_s29 + $0x48] sm:$0xff]  ;;  %s441_s3 = smov [#allocation5]  }
  0x3d   : > { %170 = vst [vmem:[%s565_s24 + $0x40] sm:$0xff] %v146_v8  ;;  %v148_v10 = vld [vmem:[%s556_s29 + $0x50] sm:$0xff]  ;;  %v149_v11 = vld [vmem:[%s556_s29 + $0x58] sm:$0xff]  ;;  %171 = vst [vmem:[%s565_s24 + $0x48] sm:$0xff] %v147_v9  ;;  %p372_p12 = pnand %p371_p6, %p670_p11  ;;  %s374_s4 = sshll.u32 %s441_s3, 4  ;;  %s375_s4 = int_to_ptr.vmem [resolvable:$false] %s374_s4 }
  0x3e   : > { %172 = vst [vmem:[%s565_s24 + $0x50] sm:$0xff] %v148_v10  ;;  %173 = vst [vmem:[%s565_s24 + $0x58] sm:$0xff] %v149_v11  ;;  %v150_v12 = vld [vmem:[%s556_s29 + $0x60] sm:$0xff]  ;;  %v151_v13 = vld [vmem:[%s556_s29 + $0x68] sm:$0xff]  ;;  %s376_s5 = scalar_lea.vmem %s375_s4, 6144  ;;  %p377_p8 = scmp.lt.s32.totalorder %s599_s25, %s375_s4 }
  0x3f   : > { %v152_v14 = vld [vmem:[%s556_s29 + $0x70] sm:$0xff]  ;;  %174 = vst [vmem:[%s565_s24 + $0x60] sm:$0xff] %v150_v12  ;;  %175 = vst [vmem:[%s565_s24 + $0x68] sm:$0xff] %v151_v13  ;;  %v153_v15 = vld [vmem:[%s556_s29 + $0x78] sm:$0xff]  ;;  %p373_p13 = pneg %p372_p12  ;;  %p378_p10 = scmp.lt.s32.totalorder %s376_s5, %s370_s2 }
  0x40   : > { %176 = vst [vmem:[%s565_s24 + $0x70] sm:$0xff] %v152_v14  ;;  %v154_v16 = vld [vmem:[%s556_s29 + $0x80] sm:$0xff]  ;;  %v155_v17 = vld [vmem:[%s556_s29 + $0x88] sm:$0xff]  ;;  %177 = vst [vmem:[%s565_s24 + $0x78] sm:$0xff] %v153_v15 }
  0x41   : > { %178 = vst [vmem:[%s565_s24 + $0x80] sm:$0xff] %v154_v16  ;;  %179 = vst [vmem:[%s565_s24 + $0x88] sm:$0xff] %v155_v17  ;;  %v156_v18 = vld [vmem:[%s556_s29 + $0x90] sm:$0xff]  ;;  %v157_v19 = vld [vmem:[%s556_s29 + $0x98] sm:$0xff]  ;;  %p379_p0 = por %p378_p10, %p377_p8 }
  0x42   : > { %v158_v20 = vld [vmem:[%s556_s29 + $0xa0] sm:$0xff]  ;;  %180 = vst [vmem:[%s565_s24 + $0x90] sm:$0xff] %v156_v18  ;;  %181 = vst [vmem:[%s565_s24 + $0x98] sm:$0xff] %v157_v19  ;;  %v159_v21 = vld [vmem:[%s556_s29 + $0xa8] sm:$0xff] }
  0x43   : > { %182 = vst [vmem:[%s565_s24 + $0xa0] sm:$0xff] %v158_v20  ;;  %v160_v22 = vld [vmem:[%s556_s29 + $0xb0] sm:$0xff]  ;;  %v161_v23 = vld [vmem:[%s556_s29 + $0xb8] sm:$0xff]  ;;  %183 = vst [vmem:[%s565_s24 + $0xa8] sm:$0xff] %v159_v21  ;;  %p380_p2 = pnand %p379_p0, %p373_p13 }
  0x44   : > { %184 = vst [vmem:[%s565_s24 + $0xb0] sm:$0xff] %v160_v22  ;;  %185 = vst [vmem:[%s565_s24 + $0xb8] sm:$0xff] %v161_v23 }
  0x45   : > { %383 = shalt.err (!%p380_p2)
}
  0x46   : > { %s384_s11 = scalar_lea.hbm %s610_s28, 3072  ;;  %s388_s19 = scalar_lea.hbm %s664_s1, 6144 }
  0x47   : > { %p385_p4 = scmp.ne.s32.totalorder %s610_s28, %s384_s11  ;;  %p389_p9 = scmp.lt.u32.totalorder %s610_s28, %s664_s1 }
  0x48   : > { %p390_p1 = scmp.lt.u32.totalorder %s388_s19, %s384_s11  ;;  %p392_p6 = scmp.lt.u32.totalorder %s384_s11, %s610_s28 }
  0x49   : > { %p386_p5 = pnand %p385_p4, %p670_p11 }
  0x4a   : > { %p391_p3 = por %p390_p1, %p389_p9 }
  0x4b   : > { %p387_p7 = pneg %p386_p5 }
  0x4c   : > { %p393_p12 = por %p392_p6, %p391_p3 }
  0x4e   : > { %p394_p13 = pnand %p393_p12, %p387_p7 }
  0x50   : > { %397 = shalt.err (!%p394_p13)
}
  0x51   : > { %s442_s23 = smov 768   ;;  %s443_s26 = smov 48  }
  0x52   : > { %292 = dma.vmem_to_hbm [thread:$0]  (%p670_p11), %s599_s25, 3072, %s610_s28, %s187_s30, %s442_s23, %s442_s23, %s443_s26  }
  0x53 PF: > { %s216_s29 = sand.u32 1, %s424_s6   ;;  %p671_p8 = scmp.ne.s32.totalorder %s668_s18, 0 }
  0x54   : > { %p672_p10 = scmp.ge.s32.totalorder %s436_s9, 2  ;;  %s217_s24 = scalar_lea.sflag [#allocation4], %s216_s29 }
  0x56   : > { %p299_p0 = pnand %p672_p10, %p671_p8 }
  0x58   : > { %419 = dma.done.wait (!%p299_p0), %s217_s24, 3072  }
  0x59   : > { %421 = vsyncadd (!%p299_p0), %s217_s24, 4294964224  ;;  %p14_p2 = scmp.ge.s32.totalorder %s479_s12, 4   ;;  %s673_s6 = smov %s428_s7 }
  0x5a   : > { %s674_s7 = smov %s432_s8  ;;  %s675_s8 = smov %s491_s15 }
  0x5b   : > { %s676_s9 = smov %s479_s12  ;;  %16 = sbr.rel (!%p14_p2) target bundleno = 5 (0x5), region = 69 }
  0x62   :  { %222 = vsyncpa [#allocation3], 1 }
  0x63   :  { %224 = vsyncpa [#allocation3 + $0x1], 1 }
  0x64   :  { %225 = vsyncpa [#allocation4], 1 }
  0x65   :  { %227 = vsyncpa [#allocation4 + $0x1], 1 }

</bundles_post_ra>
